<compile_context>
chip_gen: v7x
topology: tpu7x:2x2x1
jax: 0.10.0
libtpu: 0.0.40
codegen_flags: <defaults>
</compile_context>

<pallas_src>
import jax
import jax.numpy as jnp
from jax.experimental import pallas as pl
from jax.experimental.pallas import tpu as pltpu

B, T, H, E, L = 2, 8, 32, 32, 32     # batch, enc time, o_size, embed_dim, num_letter
BN_EPS = 1e-5                        # PyTorch BatchNorm1d default eps
NEG_BIG = 1e30                       # additive mask value (binary mask -> exact masking)

# ---- activation slab column layout ([B, 208]) ----
_X0 = 0                              # cat(y_1, c_1, sh_1[0])    width E + 2H = 96
_SH1P = _X0 + E + 2 * H              # 96
_SC0P = _SH1P + H                    # 128
_SC1P = _SC0P + H                    # 160
_AMSK = _SC1P + H                    # 192  additive attention mask, width B*T = 16
_ACT_W = _AMSK + B * T               # 208

# ---- big bf16 weight slab row layout ([160, 4H]) ----
_W0 = 0                              # [wih0^T ; whh0^T]  rows 0:96
_W1IH = _W0 + E + 2 * H              # 96   wih1^T rows 96:128
_W1HH = _W1IH + H                    # 128  whh1^T rows 128:160
_WBIG_R = _W1HH + H                  # 160

# ---- small f32 weight slab row layout ([100, 32]) ----
_WL1 = 0                             # linear1^T rows 0:32
_WL2 = _WL1 + H                      # 32
_WL3 = _WL2 + H                      # 64
_BL12 = _WL3 + E                     # 96
_GAMMA = _BL12 + 1                   # 97
_BETA = _GAMMA + 1                   # 98
_BL3 = _BETA + 1                     # 99
_W32_R = _BL3 + 1                    # 100

# ---- packed output slab column layout ([B, 256]) ----
_OUT0 = 0
_C0 = _OUT0 + L
_SH00 = _C0 + H
_SH10 = _SH00 + H
_SC00 = _SH10 + H
_SC10 = _SC00 + H
_ATT0 = _SC10 + H                    # 192, width B*T = 16 (flat attention)
_SLAB = 256


def speller_kernel(act_ref, wbig_ref, b128_ref, w32_ref, hkt_ref, hvf_ref, slab_ref):
    f32, bf16 = jnp.float32, jnp.bfloat16

    # ---- LSTM cell 0: single fused matmul (input + hidden weights stacked) ----
    x0 = act_ref[:, _X0:_X0 + E + 2 * H].astype(bf16)                      # [B, 96]
    g0 = (jnp.dot(x0, wbig_ref[_W0:_W0 + E + 2 * H, :],
                  preferred_element_type=f32) + b128_ref[0:1, :])          # [B, 4H]
    i0 = jax.nn.sigmoid(g0[:, 0 * H:1 * H])
    f0 = jax.nn.sigmoid(g0[:, 1 * H:2 * H])
    gg0 = jnp.tanh(g0[:, 2 * H:3 * H])
    o0 = jax.nn.sigmoid(g0[:, 3 * H:4 * H])
    sc0 = f0 * act_ref[:, _SC0P:_SC0P + H] + i0 * gg0
    sh0 = o0 * jnp.tanh(sc0)

    # ---- LSTM cell 1 ----
    sh1p = act_ref[:, _SH1P:_SH1P + H]
    g1 = (jnp.dot(sh0.astype(bf16), wbig_ref[_W1IH:_W1IH + H, :],
                  preferred_element_type=f32)
          + jnp.dot(sh1p.astype(bf16), wbig_ref[_W1HH:_W1HH + H, :],
                    preferred_element_type=f32)
          + b128_ref[1:2, :])                                              # [B, 4H]
    i1 = jax.nn.sigmoid(g1[:, 0 * H:1 * H])
    f1 = jax.nn.sigmoid(g1[:, 1 * H:2 * H])
    gg1 = jnp.tanh(g1[:, 2 * H:3 * H])
    o1 = jax.nn.sigmoid(g1[:, 3 * H:4 * H])
    sc1 = f1 * act_ref[:, _SC1P:_SC1P + H] + i1 * gg1
    sh1 = o1 * jnp.tanh(sc1)

    # ---- attention: flat 2-D MXU matmuls + block-diagonal masked softmax ----
    scores = jnp.dot(sh1, hkt_ref[...], preferred_element_type=f32)        # [B, B*T]
    scores = scores + act_ref[:, _AMSK:_AMSK + B * T]                      # additive mask
    scores = scores - jnp.max(scores, axis=-1, keepdims=True)
    p = jnp.exp(scores)
    denom = jnp.sum(p, axis=-1, keepdims=True)
    att = p * pl.reciprocal(denom, approx=True)                            # [B, B*T]

    # ---- context: one flat matmul (cross-batch columns are exactly zero) ----
    c = jnp.dot(att, hvf_ref[...], preferred_element_type=f32)             # [B, H]

    # ---- out = linear1(sh1) + linear2(c) (two tiny dots, no VMEM round-trip) ----
    out = (jnp.dot(sh1, w32_ref[_WL1:_WL1 + H, :], preferred_element_type=f32)
           + jnp.dot(c, w32_ref[_WL2:_WL2 + H, :], preferred_element_type=f32)
           + w32_ref[_BL12:_BL12 + 1, :])

    # ---- BatchNorm1d (training-mode batch statistics, biased variance) ----
    mu = jnp.mean(out, axis=0, keepdims=True)
    var = jnp.mean((out - mu) ** 2, axis=0, keepdims=True)
    out = ((out - mu) * jax.lax.rsqrt(var + BN_EPS) * w32_ref[_GAMMA:_GAMMA + 1, :]
           + w32_ref[_BETA:_BETA + 1, :])

    # ---- ReLU + linear3 ----
    out = jnp.maximum(out, 0.0)
    out = (jnp.dot(out, w32_ref[_WL3:_WL3 + E, :], preferred_element_type=f32)
           + w32_ref[_BL3:_BL3 + 1, :])

    # ---- packed output slab (single writeback DMA; wrapper slices it) ----
    slab_ref[:, _OUT0:_OUT0 + L] = out
    slab_ref[:, _C0:_C0 + H] = c
    slab_ref[:, _SH00:_SH00 + H] = sh0
    slab_ref[:, _SH10:_SH10 + H] = sh1
    slab_ref[:, _SC00:_SC00 + H] = sc0
    slab_ref[:, _SC10:_SC10 + H] = sc1
    slab_ref[:, _ATT0:_ATT0 + B * T] = att


def init_params(key):
    """Deterministic synthetic parameters (PyTorch shapes), packed into kernel slabs."""
    ks = jax.random.split(key, 14)

    def u(k, shape, scale=0.1):
        return jax.random.uniform(k, shape, jnp.float32, -scale, scale)

    # PyTorch LSTMCell: weight_ih (4H, in), weight_hh (4H, H), gate order i,f,g,o
    w_ih0 = u(ks[0], (4 * H, E + H)); w_hh0 = u(ks[1], (4 * H, H))
    b_ih0 = u(ks[2], (4 * H,));       b_hh0 = u(ks[3], (4 * H,))
    w_ih1 = u(ks[4], (4 * H, H));     w_hh1 = u(ks[5], (4 * H, H))
    b_ih1 = u(ks[6], (4 * H,));       b_hh1 = u(ks[7], (4 * H,))
    w1 = u(ks[8], (E, H));  b1 = u(ks[9], (E,))
    w2 = u(ks[10], (E, H)); b2 = u(ks[11], (E,))
    w3 = u(ks[12], (L, E)); b3 = u(ks[13], (L,))
    gamma = jnp.ones((E,), jnp.float32)
    beta = jnp.zeros((E,), jnp.float32)

    # Big bf16 weight slab [160, 4H]: [wih0^T ; whh0^T ; wih1^T ; whh1^T]
    wbig = jnp.concatenate([w_ih0.T, w_hh0.T, w_ih1.T, w_hh1.T],
                           axis=0).astype(jnp.bfloat16)
    # f32 fused LSTM biases [2, 4H]
    b128 = jnp.stack([b_ih0 + b_hh0, b_ih1 + b_hh1], axis=0)
    # Small f32 weight slab [100, 32]
    w32 = jnp.concatenate(
        [w1.T, w2.T, w3.T,
         (b1 + b2)[None, :], gamma[None, :], beta[None, :], b3[None, :]], axis=0)

    return dict(wbig=wbig, b128=b128, w32=w32)


def speller_forward(hk, hv, y_1, c_1, sh_1, sc_1, mask, p):
    # Additive block-diagonal attention mask over the flattened [B*T] key axis:
    # query batch b may only attend to its own batch's valid (mask==1) time steps.
    same_b = jnp.eye(B, dtype=jnp.float32)                       # [B, B]
    valid = same_b[:, :, None] * mask[None, :, :]                # [B(q), B(k), T]
    addmask = (valid.reshape(B, B * T) - 1.0) * NEG_BIG          # 0 valid, -1e30 masked

    # One packed activation slab (single input DMA for all per-step state).
    act = jnp.concatenate(
        [y_1, c_1, sh_1[0], sh_1[1], sc_1[0], sc_1[1], addmask], axis=1)   # [B, 208]
    hkt = hk.reshape(B * T, H).T                                  # [H, B*T]
    hvf = hv.reshape(B * T, H)                                    # [B*T, H]

    vmem = pl.BlockSpec(memory_space=pltpu.MemorySpace.VMEM)
    slab = pl.pallas_call(
        speller_kernel,
        out_shape=jax.ShapeDtypeStruct((B, _SLAB), jnp.float32),
        in_specs=[vmem] * 6,
        out_specs=vmem,
    )(act, p["wbig"], p["b128"], p["w32"], hkt, hvf)

    out = slab[:, _OUT0:_OUT0 + L]
    c = slab[:, _C0:_C0 + H]
    sh0 = slab[:, _SH00:_SH00 + H]
    sh1 = slab[:, _SH10:_SH10 + H]
    sc0 = slab[:, _SC00:_SC00 + H]
    sc1 = slab[:, _SC10:_SC10 + H]
    atten_vec = slab[0, _ATT0:_ATT0 + T]     # temp[0] in the PyTorch code (batch-0 block)
    return out, c, [sh0, sh1], [sc0, sc1], atten_vec


if __name__ == "__main__":
    key = jax.random.PRNGKey(0)
    k_in, k_par = jax.random.split(key)
    ki = jax.random.split(k_in, 8)

    hk = jax.random.normal(ki[0], (B, T, H), jnp.float32)
    hv = jax.random.normal(ki[1], (B, T, H), jnp.float32)
    y_1 = jax.random.normal(ki[2], (B, E), jnp.float32)
    c_1 = jax.random.normal(ki[3], (B, H), jnp.float32)
    sh_1 = [jax.random.normal(ki[4], (B, H), jnp.float32),
            jax.random.normal(ki[5], (B, H), jnp.float32)]
    sc_1 = [jax.random.normal(ki[6], (B, H), jnp.float32),
            jax.random.normal(ki[7], (B, H), jnp.float32)]
    # validity mask over encoder time steps (lengths 8 and 5)
    lengths = jnp.array([8, 5], jnp.int32)
    mask = (jnp.arange(T)[None, :] < lengths[:, None]).astype(jnp.float32)

    params = init_params(k_par)

    out, c, sh, sc, atten_vec = speller_forward(hk, hv, y_1, c_1, sh_1, sc_1, mask, params)
    jax.block_until_ready((out, c, sh, sc, atten_vec))

    assert out.shape == (B, L) and c.shape == (B, H)
    assert sh[0].shape == (B, H) and sc[1].shape == (B, H)
    assert atten_vec.shape == (T,)
    print("KERNEL_OK")
</pallas_src>

<mosaic_0001>
module attributes {stable_mosaic.version = 11 : i64} {
  func.func @speller_kernel(%arg0: memref<2x208xf32, #tpu.memory_space<vmem>>, %arg1: memref<160x128xbf16, #tpu.memory_space<vmem>>, %arg2: memref<2x128xf32, #tpu.memory_space<vmem>>, %arg3: memref<100x32xf32, #tpu.memory_space<vmem>>, %arg4: memref<32x16xf32, #tpu.memory_space<vmem>>, %arg5: memref<16x32xf32, #tpu.memory_space<vmem>>, %arg6: memref<2x256xf32, #tpu.memory_space<vmem>>) attributes {dimension_semantics = [], scalar_prefetch = 0 : i64, scratch_operands = 0 : i64, tpu.core_type = #tpu.core_type<tc>} {
    %c0 = arith.constant 0 : index
    %c0_0 = arith.constant 0 : index
    %0 = vector.load %arg0[%c0, %c0_0] : memref<2x208xf32, #tpu.memory_space<vmem>>, vector<2x96xf32>
    %1 = arith.truncf %0 : vector<2x96xf32> to vector<2x96xbf16>
    %c0_1 = arith.constant 0 : index
    %c0_2 = arith.constant 0 : index
    %2 = vector.load %arg1[%c0_1, %c0_2] : memref<160x128xbf16, #tpu.memory_space<vmem>>, vector<96x128xbf16>
    %cst = arith.constant dense<0.000000e+00> : vector<2x128xf32>
    %3 = tpu.matmul %1, %2, %cst {dimension_numbers = #tpu.dot_dimension_numbers<[1], [0], [0], [1], [0, 0, 1, 1], [], []>} : vector<2x96xbf16>, vector<96x128xbf16>, vector<2x128xf32> -> vector<2x128xf32>
    %c0_3 = arith.constant 0 : index
    %c0_4 = arith.constant 0 : index
    %4 = vector.load %arg2[%c0_3, %c0_4] : memref<2x128xf32, #tpu.memory_space<vmem>>, vector<1x128xf32>
    %5 = vector.broadcast %4 : vector<1x128xf32> to vector<2x128xf32>
    %6 = arith.addf %3, %5 : vector<2x128xf32>
    %7 = vector.extract_strided_slice %6 {offsets = [0, 0], sizes = [2, 32], strides = [1, 1]} : vector<2x128xf32> to vector<2x32xf32>
    %8 = arith.negf %7 : vector<2x32xf32>
    %9 = math.exp %8 : vector<2x32xf32>
    %cst_5 = arith.constant 1.000000e+00 : f32
    %10 = vector.broadcast %cst_5 : f32 to vector<2x32xf32>
    %11 = arith.addf %10, %9 : vector<2x32xf32>
    %12 = arith.divf %10, %11 : vector<2x32xf32>
    %13 = vector.extract_strided_slice %6 {offsets = [0, 32], sizes = [2, 32], strides = [1, 1]} : vector<2x128xf32> to vector<2x32xf32>
    %14 = arith.negf %13 : vector<2x32xf32>
    %15 = math.exp %14 : vector<2x32xf32>
    %cst_6 = arith.constant 1.000000e+00 : f32
    %16 = vector.broadcast %cst_6 : f32 to vector<2x32xf32>
    %17 = arith.addf %16, %15 : vector<2x32xf32>
    %18 = arith.divf %16, %17 : vector<2x32xf32>
    %19 = vector.extract_strided_slice %6 {offsets = [0, 64], sizes = [2, 32], strides = [1, 1]} : vector<2x128xf32> to vector<2x32xf32>
    %20 = math.tanh %19 : vector<2x32xf32>
    %21 = vector.extract_strided_slice %6 {offsets = [0, 96], sizes = [2, 32], strides = [1, 1]} : vector<2x128xf32> to vector<2x32xf32>
    %22 = arith.negf %21 : vector<2x32xf32>
    %23 = math.exp %22 : vector<2x32xf32>
    %cst_7 = arith.constant 1.000000e+00 : f32
    %24 = vector.broadcast %cst_7 : f32 to vector<2x32xf32>
    %25 = arith.addf %24, %23 : vector<2x32xf32>
    %26 = arith.divf %24, %25 : vector<2x32xf32>
    %c0_8 = arith.constant 0 : index
    %c128 = arith.constant 128 : index
    %27 = vector.load %arg0[%c0_8, %c128] : memref<2x208xf32, #tpu.memory_space<vmem>>, vector<2x32xf32>
    %28 = arith.mulf %18, %27 : vector<2x32xf32>
    %29 = arith.mulf %12, %20 : vector<2x32xf32>
    %30 = arith.addf %28, %29 : vector<2x32xf32>
    %31 = math.tanh %30 : vector<2x32xf32>
    %32 = arith.mulf %26, %31 : vector<2x32xf32>
    %c0_9 = arith.constant 0 : index
    %c96 = arith.constant 96 : index
    %33 = vector.load %arg0[%c0_9, %c96] : memref<2x208xf32, #tpu.memory_space<vmem>>, vector<2x32xf32>
    %34 = arith.truncf %32 : vector<2x32xf32> to vector<2x32xbf16>
    %c96_10 = arith.constant 96 : index
    %c0_11 = arith.constant 0 : index
    %35 = vector.load %arg1[%c96_10, %c0_11] : memref<160x128xbf16, #tpu.memory_space<vmem>>, vector<32x128xbf16>
    %cst_12 = arith.constant dense<0.000000e+00> : vector<2x128xf32>
    %36 = tpu.matmul %34, %35, %cst_12 {dimension_numbers = #tpu.dot_dimension_numbers<[1], [0], [0], [1], [0, 0, 1, 1], [], []>} : vector<2x32xbf16>, vector<32x128xbf16>, vector<2x128xf32> -> vector<2x128xf32>
    %37 = arith.truncf %33 : vector<2x32xf32> to vector<2x32xbf16>
    %c128_13 = arith.constant 128 : index
    %c0_14 = arith.constant 0 : index
    %38 = vector.load %arg1[%c128_13, %c0_14] : memref<160x128xbf16, #tpu.memory_space<vmem>>, vector<32x128xbf16>
    %cst_15 = arith.constant dense<0.000000e+00> : vector<2x128xf32>
    %39 = tpu.matmul %37, %38, %cst_15 {dimension_numbers = #tpu.dot_dimension_numbers<[1], [0], [0], [1], [0, 0, 1, 1], [], []>} : vector<2x32xbf16>, vector<32x128xbf16>, vector<2x128xf32> -> vector<2x128xf32>
    %40 = arith.addf %36, %39 : vector<2x128xf32>
    %c1 = arith.constant 1 : index
    %c0_16 = arith.constant 0 : index
    %41 = vector.load %arg2[%c1, %c0_16] : memref<2x128xf32, #tpu.memory_space<vmem>>, vector<1x128xf32>
    %42 = vector.broadcast %41 : vector<1x128xf32> to vector<2x128xf32>
    %43 = arith.addf %40, %42 : vector<2x128xf32>
    %44 = vector.extract_strided_slice %43 {offsets = [0, 0], sizes = [2, 32], strides = [1, 1]} : vector<2x128xf32> to vector<2x32xf32>
    %45 = arith.negf %44 : vector<2x32xf32>
    %46 = math.exp %45 : vector<2x32xf32>
    %cst_17 = arith.constant 1.000000e+00 : f32
    %47 = vector.broadcast %cst_17 : f32 to vector<2x32xf32>
    %48 = arith.addf %47, %46 : vector<2x32xf32>
    %49 = arith.divf %47, %48 : vector<2x32xf32>
    %50 = vector.extract_strided_slice %43 {offsets = [0, 32], sizes = [2, 32], strides = [1, 1]} : vector<2x128xf32> to vector<2x32xf32>
    %51 = arith.negf %50 : vector<2x32xf32>
    %52 = math.exp %51 : vector<2x32xf32>
    %cst_18 = arith.constant 1.000000e+00 : f32
    %53 = vector.broadcast %cst_18 : f32 to vector<2x32xf32>
    %54 = arith.addf %53, %52 : vector<2x32xf32>
    %55 = arith.divf %53, %54 : vector<2x32xf32>
    %56 = vector.extract_strided_slice %43 {offsets = [0, 64], sizes = [2, 32], strides = [1, 1]} : vector<2x128xf32> to vector<2x32xf32>
    %57 = math.tanh %56 : vector<2x32xf32>
    %58 = vector.extract_strided_slice %43 {offsets = [0, 96], sizes = [2, 32], strides = [1, 1]} : vector<2x128xf32> to vector<2x32xf32>
    %59 = arith.negf %58 : vector<2x32xf32>
    %60 = math.exp %59 : vector<2x32xf32>
    %cst_19 = arith.constant 1.000000e+00 : f32
    %61 = vector.broadcast %cst_19 : f32 to vector<2x32xf32>
    %62 = arith.addf %61, %60 : vector<2x32xf32>
    %63 = arith.divf %61, %62 : vector<2x32xf32>
    %c0_20 = arith.constant 0 : index
    %c160 = arith.constant 160 : index
    %64 = vector.load %arg0[%c0_20, %c160] : memref<2x208xf32, #tpu.memory_space<vmem>>, vector<2x32xf32>
    %65 = arith.mulf %55, %64 : vector<2x32xf32>
    %66 = arith.mulf %49, %57 : vector<2x32xf32>
    %67 = arith.addf %65, %66 : vector<2x32xf32>
    %68 = math.tanh %67 : vector<2x32xf32>
    %69 = arith.mulf %63, %68 : vector<2x32xf32>
    %c0_21 = arith.constant 0 : index
    %c0_22 = arith.constant 0 : index
    %70 = vector.load %arg4[%c0_21, %c0_22] : memref<32x16xf32, #tpu.memory_space<vmem>>, vector<32x16xf32>
    %cst_23 = arith.constant dense<0.000000e+00> : vector<2x16xf32>
    %71 = tpu.matmul %69, %70, %cst_23 {dimension_numbers = #tpu.dot_dimension_numbers<[1], [0], [0], [1], [0, 0, 1, 1], [], []>} : vector<2x32xf32>, vector<32x16xf32>, vector<2x16xf32> -> vector<2x16xf32>
    %c0_24 = arith.constant 0 : index
    %c192 = arith.constant 192 : index
    %72 = vector.load %arg0[%c0_24, %c192] : memref<2x208xf32, #tpu.memory_space<vmem>>, vector<2x16xf32>
    %73 = arith.addf %71, %72 : vector<2x16xf32>
    %cst_25 = arith.constant dense<0xFF800000> : vector<2xf32>
    %74 = vector.multi_reduction <maximumf>, %73, %cst_25 [1] : vector<2x16xf32> to vector<2xf32>
    %75 = vector.shape_cast %74 : vector<2xf32> to vector<2x1xf32>
    %76 = vector.broadcast %75 : vector<2x1xf32> to vector<2x16xf32>
    %77 = arith.subf %73, %76 : vector<2x16xf32>
    %78 = math.exp %77 : vector<2x16xf32>
    %cst_26 = arith.constant dense<0.000000e+00> : vector<2xf32>
    %79 = vector.multi_reduction <add>, %78, %cst_26 [1] : vector<2x16xf32> to vector<2xf32>
    %80 = vector.shape_cast %79 : vector<2xf32> to vector<2x1xf32>
    %81 = tpu.reciprocal %80 {approx = true} : vector<2x1xf32> -> vector<2x1xf32>
    %82 = vector.broadcast %81 : vector<2x1xf32> to vector<2x16xf32>
    %83 = arith.mulf %78, %82 : vector<2x16xf32>
    %c0_27 = arith.constant 0 : index
    %c0_28 = arith.constant 0 : index
    %84 = vector.load %arg5[%c0_27, %c0_28] : memref<16x32xf32, #tpu.memory_space<vmem>>, vector<16x32xf32>
    %cst_29 = arith.constant dense<0.000000e+00> : vector<2x32xf32>
    %85 = tpu.matmul %83, %84, %cst_29 {dimension_numbers = #tpu.dot_dimension_numbers<[1], [0], [0], [1], [0, 0, 1, 1], [], []>} : vector<2x16xf32>, vector<16x32xf32>, vector<2x32xf32> -> vector<2x32xf32>
    %c0_30 = arith.constant 0 : index
    %c0_31 = arith.constant 0 : index
    %86 = vector.load %arg3[%c0_30, %c0_31] : memref<100x32xf32, #tpu.memory_space<vmem>>, vector<32x32xf32>
    %cst_32 = arith.constant dense<0.000000e+00> : vector<2x32xf32>
    %87 = tpu.matmul %69, %86, %cst_32 {dimension_numbers = #tpu.dot_dimension_numbers<[1], [0], [0], [1], [0, 0, 1, 1], [], []>} : vector<2x32xf32>, vector<32x32xf32>, vector<2x32xf32> -> vector<2x32xf32>
    %c32 = arith.constant 32 : index
    %c0_33 = arith.constant 0 : index
    %88 = vector.load %arg3[%c32, %c0_33] : memref<100x32xf32, #tpu.memory_space<vmem>>, vector<32x32xf32>
    %cst_34 = arith.constant dense<0.000000e+00> : vector<2x32xf32>
    %89 = tpu.matmul %85, %88, %cst_34 {dimension_numbers = #tpu.dot_dimension_numbers<[1], [0], [0], [1], [0, 0, 1, 1], [], []>} : vector<2x32xf32>, vector<32x32xf32>, vector<2x32xf32> -> vector<2x32xf32>
    %90 = arith.addf %87, %89 : vector<2x32xf32>
    %c96_35 = arith.constant 96 : index
    %c0_36 = arith.constant 0 : index
    %91 = vector.load %arg3[%c96_35, %c0_36] : memref<100x32xf32, #tpu.memory_space<vmem>>, vector<1x32xf32>
    %92 = vector.broadcast %91 : vector<1x32xf32> to vector<2x32xf32>
    %93 = arith.addf %90, %92 : vector<2x32xf32>
    %cst_37 = arith.constant dense<0.000000e+00> : vector<32xf32>
    %94 = vector.multi_reduction <add>, %93, %cst_37 [0] : vector<2x32xf32> to vector<32xf32>
    %95 = vector.shape_cast %94 : vector<32xf32> to vector<1x32xf32>
    %cst_38 = arith.constant 2.000000e+00 : f32
    %96 = vector.broadcast %cst_38 : f32 to vector<1x32xf32>
    %97 = arith.divf %95, %96 : vector<1x32xf32>
    %98 = vector.broadcast %97 : vector<1x32xf32> to vector<2x32xf32>
    %99 = arith.subf %93, %98 : vector<2x32xf32>
    %100 = arith.mulf %99, %99 : vector<2x32xf32>
    %cst_39 = arith.constant dense<0.000000e+00> : vector<32xf32>
    %101 = vector.multi_reduction <add>, %100, %cst_39 [0] : vector<2x32xf32> to vector<32xf32>
    %102 = vector.shape_cast %101 : vector<32xf32> to vector<1x32xf32>
    %cst_40 = arith.constant 2.000000e+00 : f32
    %103 = vector.broadcast %cst_40 : f32 to vector<1x32xf32>
    %104 = arith.divf %102, %103 : vector<1x32xf32>
    %105 = vector.broadcast %97 : vector<1x32xf32> to vector<2x32xf32>
    %106 = arith.subf %93, %105 : vector<2x32xf32>
    %cst_41 = arith.constant 9.99999974E-6 : f32
    %107 = vector.broadcast %cst_41 : f32 to vector<1x32xf32>
    %108 = arith.addf %104, %107 : vector<1x32xf32>
    %109 = math.rsqrt %108 : vector<1x32xf32>
    %110 = vector.broadcast %109 : vector<1x32xf32> to vector<2x32xf32>
    %111 = arith.mulf %106, %110 : vector<2x32xf32>
    %c97 = arith.constant 97 : index
    %c0_42 = arith.constant 0 : index
    %112 = vector.load %arg3[%c97, %c0_42] : memref<100x32xf32, #tpu.memory_space<vmem>>, vector<1x32xf32>
    %113 = vector.broadcast %112 : vector<1x32xf32> to vector<2x32xf32>
    %114 = arith.mulf %111, %113 : vector<2x32xf32>
    %c98 = arith.constant 98 : index
    %c0_43 = arith.constant 0 : index
    %115 = vector.load %arg3[%c98, %c0_43] : memref<100x32xf32, #tpu.memory_space<vmem>>, vector<1x32xf32>
    %116 = vector.broadcast %115 : vector<1x32xf32> to vector<2x32xf32>
    %117 = arith.addf %114, %116 : vector<2x32xf32>
    %cst_44 = arith.constant 0.000000e+00 : f32
    %118 = vector.broadcast %cst_44 : f32 to vector<2x32xf32>
    %119 = arith.maximumf %117, %118 : vector<2x32xf32>
    %c64 = arith.constant 64 : index
    %c0_45 = arith.constant 0 : index
    %120 = vector.load %arg3[%c64, %c0_45] : memref<100x32xf32, #tpu.memory_space<vmem>>, vector<32x32xf32>
    %cst_46 = arith.constant dense<0.000000e+00> : vector<2x32xf32>
    %121 = tpu.matmul %119, %120, %cst_46 {dimension_numbers = #tpu.dot_dimension_numbers<[1], [0], [0], [1], [0, 0, 1, 1], [], []>} : vector<2x32xf32>, vector<32x32xf32>, vector<2x32xf32> -> vector<2x32xf32>
    %c99 = arith.constant 99 : index
    %c0_47 = arith.constant 0 : index
    %122 = vector.load %arg3[%c99, %c0_47] : memref<100x32xf32, #tpu.memory_space<vmem>>, vector<1x32xf32>
    %123 = vector.broadcast %122 : vector<1x32xf32> to vector<2x32xf32>
    %124 = arith.addf %121, %123 : vector<2x32xf32>
    %c0_48 = arith.constant 0 : index
    %c0_49 = arith.constant 0 : index
    %125 = vector.load %arg6[%c0_48, %c0_49] : memref<2x256xf32, #tpu.memory_space<vmem>>, vector<2x32xf32>
    tpu.vector_store %arg6[%c0_48, %c0_49], %124 {strides = array<i32>} : memref<2x256xf32, #tpu.memory_space<vmem>>, vector<2x32xf32>,
    %c0_50 = arith.constant 0 : index
    %c32_51 = arith.constant 32 : index
    %126 = vector.load %arg6[%c0_50, %c32_51] : memref<2x256xf32, #tpu.memory_space<vmem>>, vector<2x32xf32>
    tpu.vector_store %arg6[%c0_50, %c32_51], %85 {strides = array<i32>} : memref<2x256xf32, #tpu.memory_space<vmem>>, vector<2x32xf32>,
    %c0_52 = arith.constant 0 : index
    %c64_53 = arith.constant 64 : index
    %127 = vector.load %arg6[%c0_52, %c64_53] : memref<2x256xf32, #tpu.memory_space<vmem>>, vector<2x32xf32>
    tpu.vector_store %arg6[%c0_52, %c64_53], %32 {strides = array<i32>} : memref<2x256xf32, #tpu.memory_space<vmem>>, vector<2x32xf32>,
    %c0_54 = arith.constant 0 : index
    %c96_55 = arith.constant 96 : index
    %128 = vector.load %arg6[%c0_54, %c96_55] : memref<2x256xf32, #tpu.memory_space<vmem>>, vector<2x32xf32>
    tpu.vector_store %arg6[%c0_54, %c96_55], %69 {strides = array<i32>} : memref<2x256xf32, #tpu.memory_space<vmem>>, vector<2x32xf32>,
    %c0_56 = arith.constant 0 : index
    %c128_57 = arith.constant 128 : index
    %129 = vector.load %arg6[%c0_56, %c128_57] : memref<2x256xf32, #tpu.memory_space<vmem>>, vector<2x32xf32>
    tpu.vector_store %arg6[%c0_56, %c128_57], %30 {strides = array<i32>} : memref<2x256xf32, #tpu.memory_space<vmem>>, vector<2x32xf32>,
    %c0_58 = arith.constant 0 : index
    %c160_59 = arith.constant 160 : index
    %130 = vector.load %arg6[%c0_58, %c160_59] : memref<2x256xf32, #tpu.memory_space<vmem>>, vector<2x32xf32>
    tpu.vector_store %arg6[%c0_58, %c160_59], %67 {strides = array<i32>} : memref<2x256xf32, #tpu.memory_space<vmem>>, vector<2x32xf32>,
    %c0_60 = arith.constant 0 : index
    %c192_61 = arith.constant 192 : index
    %131 = vector.load %arg6[%c0_60, %c192_61] : memref<2x256xf32, #tpu.memory_space<vmem>>, vector<2x16xf32>
    tpu.vector_store %arg6[%c0_60, %c192_61], %83 {strides = array<i32>} : memref<2x256xf32, #tpu.memory_space<vmem>>, vector<2x16xf32>,
    return
  }
}

</mosaic_0001>

<bundles_post_ra>
// kernel: tpu_custom_call.1
= control target key start
LH: loop header
LB: loop body
LE: loop exit
PB: predicated region body
PF: predicated region fallthrough
CT: control target
= control target key end

     0   :  { %v1076_v1 = vmov 0.0   ;;  %vm1077_vm0 = vmmov 0   ;;  %s1327_s0 = inlined_call_operand.vmem [shape: f32[2,208], index: 0, kind: input, shape index: {}]   ;;  %s1328_s1 = inlined_call_operand.vmem [shape: bf16[160,128], index: 1, kind: input, shape index: {}]   ;;  %s1329_s2 = inlined_call_operand.vmem [shape: f32[2,128], index: 2, kind: input, shape index: {}]   ;;  %s1330_s3 = inlined_call_operand.vmem [shape: f32[100,32], index: 3, kind: input, shape index: {}]   ;;  %s1331_s4 = inlined_call_operand.vmem [shape: f32[32,16], index: 4, kind: input, shape index: {}]   ;;  %s1332_s5 = inlined_call_operand.vmem [shape: f32[16,32], index: 5, kind: input, shape index: {}]   ;;  %s1333_s6 = inlined_call_operand.hbm [shape: f32[2,256], index: 6, kind: output, shape index: {}]  }
   0x1   :  { %v1020_v0 = vld [vmem:[%s1328_s1] sm:$0xff]   ;;  %902 = vmatprep.subr.bf16.mxu0 %v1076_v1  ;;  %918 = vmatprep.subr.bf16.mxu1 %v1076_v1  ;;  %v1021_v2 = vld [vmem:[%s1328_s1 + $0x8] sm:$0xff]   ;;  %v1022_v3 = vld [vmem:[%s1328_s1 + $0x10] sm:$0xff]  }
   0x2   :  { %903 = vmatpush3.bf16.msra.mxu0 %v1020_v0  ;;  %914 = vmatprep.mubr.msk.bf16.mxu0 %vm1077_vm0, %v1076_v1 }
   0x3   :  { %904 = vmatprep.subr.bf16.mxu0 %v1076_v1  ;;  %922 = vmatprep.mubr.msk.bf16.mxu1 %vm1077_vm0, %v1076_v1 }
   0x6   :  { %905 = vmatpush3.bf16.msra.mxu0 %v1021_v2 }
   0x7   :  { %906 = vmatprep.subr.bf16.mxu0 %v1076_v1 }
   0x8   :  { %11 = vsyncpa [#allocation3], 0  ;;  %v1023_v4 = vld [vmem:[%s1328_s1 + $0x18] sm:$0xff]   ;;  %v1024_v5 = vld [vmem:[%s1328_s1 + $0x20] sm:$0xff]   ;;  %vm80_vm1 = vcmask 785408   ;;  %s1078_s13 = smov 64  }
   0x9   :  { %v1025_v6 = vld [vmem:[%s1328_s1 + $0x28] sm:$0xff]   ;;  %v25_v7 = vld [vmem:[%s1327_s0] sm:$0x3]  ;;  %s1079_s16 = smov 32   ;;  %vm186_vm2 = vcmask 261120   ;;  %v1028_v32 = vld [vmem:[%s1328_s1 + $0x30] sm:$0xff]  }
   0xa   :  { %907 = vmatpush3.bf16.msra.mxu0 %v1022_v3  ;;  %v26_v8 = vpack.c.bf16 %v25_v7, %v25_v7  ;;  %v839_v9 = vld [vmem:[%s1329_s2] ss:$0 sm:$0xff]  ;;  %v848_v16 = vld.sshfl [vmem:[%s1327_s0 + $0x2] sm:$0x3 pattern:$0x76325410] }
   0xb   :  { %908 = vmatprep.subr.bf16.mxu0 %v1076_v1  ;;  %v160_v23 = vld [vmem:[%s1327_s0] sm:$0x3]  ;;  %v1027_v30 = vld [vmem:[%s1328_s1 + $0x48] sm:$0xff]   ;;  %v1029_v34 = vld [vmem:[%s1328_s1 + $0x38] sm:$0xff]   ;;  %v1080_v0 = vmov 0.0|0.0   ;;  %vm409_vm3 = vcmask 123904  }
   0xc   :  { %v166_v24 = vpack.c.bf16 %v160_v23, %v160_v23  ;;  %v1026_v29 = vld [vmem:[%s1328_s1 + $0x40] sm:$0xff]   ;;  %v320_v62 = vld [vmem:[%s1331_s4 + $0x8] sm:$0xff]  ;;  %v321_v63 = vld [vmem:[%s1331_s4 + $0x10] sm:$0xff]  ;;  %vm654_vm4 = vcmask 254976   ;;  %vm783_vm5 = vcmask 517376   ;;  %vm423_vm6 = vcmask 130048  }
   0xd   :  { %919 = vmatpush3.bf16.msra.mxu1 %v1026_v29  ;;  %v855_v44 = vld [vmem:[%s1329_s2 + $0x1] ss:$0 sm:$0xff]  ;;  %v301_v57 = vld [vmem:[%s1327_s0 + $0x2] sm:$0x3]  ;;  %v322_v3 = vld [vmem:[%s1331_s4 + $0x18] sm:$0xff]  ;;  %vm823_vm7 = vcmask 648704  }
   0xe   :  { %909 = vmatpush3.bf16.msra.mxu0 %v1023_v4  ;;  %920 = vmatprep.subr.bf16.mxu1 %v1076_v1  ;;  %v319_v61 = vld [vmem:[%s1331_s4] sm:$0xff]  ;;  %v989_v4 = vpack.c.bf16 %v322_v3, %v321_v63  ;;  %s1082_s4 = smov 96   ;;  %s1083_s21 = smov [#allocation2]   ;;  %vm796_vm8 = vcmask 779776   ;;  %vm798_vm9 = vcmask 1042176  }
   0xf   :  { %910 = vmatprep.subr.bf16.mxu0 %v1076_v1  ;;  %v986_v2 = vpack.c.bf16 %v320_v62, %v319_v61  ;;  %v421_v29 = vld [vmem:[%s1332_s5] sm:$0xff]  ;;  %s831_s22 = sshll.u32 %s1083_s21, 4  ;;  %s832_s22 = int_to_ptr.vmem [resolvable:$true] %s831_s22 }
  0x10   :  { %v861_v61 = vld [vmem:[%s1330_s3 + $0x60] ss:$0 sm:$0xff]  ;;  %s1052_s23 = scalar_lea.vmem %s832_s22, 64  ;;  %p1057_p1 = scmp.lt.s32.totalorder %s832_s22, %s832_s22 }
  0x11   :  { %921 = vmatpush3.bf16.msra.mxu1 %v1027_v30  ;;  %v422_v30 = vld [vmem:[%s1332_s5 + $0x8] sm:$0xff]  ;;  %p1053_p0 = scmp.ne.s32.totalorder %s832_s22, %s1052_s23  ;;  %p1058_p2 = scmp.lt.s32.totalorder %s1052_s23, %s1052_s23 }
  0x12   :  { %911 = vmatpush3.bf16.msra.mxu0 %v1024_v5  ;;  %926 = vmatprep.subr.bf16.mxu1 %v1076_v1 }
  0x13   :  { %912 = vmatprep.subr.bf16.mxu0 %v1076_v1  ;;  %p1059_p3 = por %p1058_p2, %p1057_p1 }
  0x15   :  { %p1060_p4 = pnand %p1059_p3, %p1053_p0 }
  0x16   :  { %913 = vmatpush3.bf16.msra.mxu0 %v1025_v6  ;;  %v1081_v6 = vmov 1983009808  }
  0x17   :  { %994 = vmatprep.subr.bf16.mxu0 %v1080_v0  ;;  %v328_v7 = vunpack.c.l.s4 %v1081_v6 }
  0x19   :  { %915 = vmatmul.mubr.msk.bf16.vlgmr.msra.gmra.mrb[0].mxu0 %vm80_vm1, %v26_v8  ;;  %v330_v8 = vlaneseq }
  0x1a   :  { %960 = vmatprep.mubr.msk.f32.mxu0 %vm1077_vm0, %v1076_v1 }
  0xec   :  { %v118_v10 = vpop.f32.mrb[0].mxu0 }
  0xed   :  { %v119_v11 = vadd.f32 %v839_v9, %v118_v10  ;;  %v916_v12 = vpop.f32.mrb[1].mxu0  ;;  %v329_v9 = vunpack.c.0.s8 %v328_v7  ;;  %v331_v10 = vshrl.u32 %v330_v8, 7 }
  0xee   :  { %v121_v13 = vpop.f32.mrb[2].mxu0 }
  0xef   :  { %1030 = vtanh.f32 %v119_v11  ;;  %v917_v14 = vpop.f32.mrb[3].mxu0  ;;  %v847_v17 = vmul.f32 -1.442695, %v119_v11  ;;  %v1221_v11 = vsub.s32 %v329_v9, %v331_v10 }
  0xf1   :  { %1032 = vpow2.f32 %v847_v17  ;;  %v333_v12 = vrot.slane %v301_v57, %v1221_v11 }
  0xf9   :  { %v1031_v15 = vpop.eup %1030 }
  0xfa   :  { %145 = vrot.lane.b32.xlu0 %v1031_v15, %s1078_s13 }
  0xfb   :  { %v1033_v18 = vpop.eup %1032 }
  0xfc   :  { %v127_v19 = vadd.f32 1.0, %v1033_v18 }
  0xfe   :  { %140 = vrot.lane.b32.xlu0 %v848_v16, %s1079_s16  ;;  %1034 = vrcp.f32 %v127_v19 }
 0x102   :  { %172 = vrot.lane.b32.xlu0 %v166_v24, %s1079_s16 }
 0x108   :  { %v1035_v20 = vpop.eup %1034 }
 0x16c   :  { %v146_v21 = vpop.permute.xlu0 %145 }
 0x16d   :  { %v148_v22 = vmul.f32 %v1035_v20, %v146_v21 }
 0x16f   :  { %150 = vrot.lane.b32.xlu1 %v148_v22, %s1079_s16 }
 0x170   :  { %v141_v25 = vpop.permute.xlu0 %140 }
 0x171   :  { %v143_v26 = vmul.f32 %v1035_v20, %v141_v25 }
 0x174   :  { %v173_v31 = vpop.permute.xlu0 %172 }
 0x175   :  { %923 = vmatmul.mubr.msk.bf16.vlgmr.msra.gmra.mrb[0].mxu1 %vm186_vm2, %v173_v31  ;;  %v992_v31 = vpack.c.bf16 %v422_v30, %v421_v29  ;;  %v864_v29 = vld [vmem:[%s1330_s3 + $0x63] ss:$0 sm:$0xff] }
 0x176   :  { %927 = vmatpush3.bf16.msra.mxu1 %v1028_v32  ;;  %930 = vmatprep.mubr.msk.bf16.mxu1 %vm1077_vm0, %v1076_v1  ;;  %v501_v32 = vld [vmem:[%s1330_s3 + $0x20] sm:$0xff] }
 0x177   :  { %928 = vmatprep.subr.bf16.mxu1 %v1076_v1 }
 0x17a   :  { %929 = vmatpush3.bf16.msra.mxu1 %v1029_v34  ;;  %v503_v34 = vld [vmem:[%s1330_s3 + $0x30] sm:$0xff] }
 0x17b   :  { %985 = vmatprep.subr.bf16.mxu1 %v1080_v0 }
 0x1e1   :  { %v151_v27 = vpop.permute.xlu1 %150 }
 0x1e2   :  { %v1166_v28 = vadd.f32 %v151_v27, %v143_v26 }
 0x1e4   :  { %1036 = vtanh.f32 %v1166_v28  ;;  %v807_v21 = vrot.slane %v1166_v28, %v1221_v11 }
 0x1ee   :  { %v1037_v33 = vpop.eup %1036 }
 0x1ef   :  { %156 = vrot.lane.b32.xlu1 %v1037_v33, %s1078_s13  ;;  %v502_v33 = vld [vmem:[%s1330_s3 + $0x28] sm:$0xff] }
 0x248   :  { %v224_v38 = vpop.f32.mrb[0].mxu1 }
 0x249   :  { %v924_v39 = vpop.f32.mrb[1].mxu1 }
 0x24a   :  { %v227_v40 = vpop.f32.mrb[2].mxu1  ;;  %v497_v39 = vld [vmem:[%s1330_s3] sm:$0xff] }
 0x24b   :  { %v925_v41 = vpop.f32.mrb[3].mxu1  ;;  %v498_v40 = vld [vmem:[%s1330_s3 + $0x8] sm:$0xff] }
 0x261   :  { %v157_v35 = vpop.permute.xlu1 %156 }
 0x262   :  { %v1188_v36 = vmul.f32 %v1035_v20, %v157_v35  ;;  %v995_v35 = vpack.c.bf16 %v502_v33, %v501_v32 }
 0x264   :  { %v161_v37 = vpack.c.bf16 %v1188_v36, %v1188_v36  ;;  %v792_v22 = vrot.slane %v1188_v36, %v1221_v11  ;;  %v504_v36 = vld [vmem:[%s1330_s3 + $0x38] sm:$0xff]  ;;  %996 = vmatpush3.bf16.msra.mxu0 %v995_v35 }
 0x265   :  { %997 = vmatprep.subr.bf16.mxu0 %v1080_v0 }
 0x266   :  { %231 = vrot.lane.b32.xlu1 %v161_v37, %s1079_s16  ;;  %v998_v37 = vpack.c.bf16 %v504_v36, %v503_v34 }
 0x268   :  { %999 = vmatpush3.bf16.msra.mxu0 %v998_v37 }
 0x269   :  { %1006 = vmatprep.subr.bf16.mxu0 %v1080_v0 }
 0x2d8   :  { %v232_v42 = vpop.permute.xlu1 %231 }
 0x2d9   :  { %931 = vmatmul.mubr.msk.bf16.vlgmr.msra.gmra.mrb[4].mxu1 %vm186_vm2, %v232_v42  ;;  %v1001_v42 = vpack.c.bf16 %v498_v40, %v497_v39 }
 0x2da   :  { %942 = vmatprep.mubr.msk.f32.mxu1 %vm1077_vm0, %v1076_v1  ;;  %987 = vmatpush3.bf16.msra.mxu1 %v986_v2 }
 0x2db   :  { %988 = vmatprep.subr.bf16.mxu1 %v1080_v0 }
 0x2de   :  { %990 = vmatpush3.bf16.msra.mxu1 %v989_v4 }
 0x2df   :  { %991 = vmatprep.subr.bf16.mxu1 %v1080_v0 }
 0x3ac   :  { %v282_v43 = vpop.f32.mrb[4].mxu1 }
 0x3ad   :  { %v283_v45 = vadd.f32 %v282_v43, %v224_v38  ;;  %v932_v46 = vpop.f32.mrb[5].mxu1 }
 0x3ae   :  { %v285_v47 = vpop.f32.mrb[6].mxu1 }
 0x3af   :  { %v293_v48 = vadd.f32 %v855_v44, %v283_v45  ;;  %v933_v49 = vpop.f32.mrb[7].mxu1  ;;  %v499_v44 = vld [vmem:[%s1330_s3 + $0x10] sm:$0xff]  ;;  %v500_v45 = vld [vmem:[%s1330_s3 + $0x18] sm:$0xff] }
 0x3b0   :  { %v1004_v46 = vpack.c.bf16 %v500_v45, %v499_v44 }
 0x3b1   :  { %1038 = vtanh.f32 %v293_v48  ;;  %v856_v51 = vmul.f32 -1.442695, %v293_v48 }
 0x3b3   :  { %1040 = vpow2.f32 %v856_v51 }
 0x3bb   :  { %v1039_v50 = vpop.eup %1038 }
 0x3bc   :  { %304 = vrot.lane.b32.xlu0 %v1039_v50, %s1078_s13 }
 0x3bd   :  { %v1041_v52 = vpop.eup %1040 }
 0x3be   :  { %v297_v53 = vadd.f32 1.0, %v1041_v52 }
 0x3c0   :  { %1042 = vrcp.f32 %v297_v53 }
 0x3ca   :  { %v1043_v54 = vpop.eup %1042 }
 0x3cb   :  { %v302_v58 = vmul.f32 %v1043_v54, %v301_v57  ;;  %v692_v57 = vld [vmem:[%s1330_s3 + $0x50] sm:$0xff] }
 0x42e   :  { %v305_v55 = vpop.permute.xlu0 %304 }
 0x42f   :  { %v307_v56 = vmul.f32 %v1043_v54, %v305_v55  ;;  %v690_v55 = vld [vmem:[%s1330_s3 + $0x40] sm:$0xff] }
 0x431   :  { %309 = vrot.lane.b32.xlu1 %v307_v56, %s1079_s16 }
 0x4a3   :  { %v310_v59 = vpop.permute.xlu1 %309 }
 0x4a4   :  { %v312_v60 = vadd.f32 %v310_v59, %v302_v58  ;;  %v693_v58 = vld [vmem:[%s1330_s3 + $0x58] sm:$0xff] }
 0x4a5   :  { %v1010_v59 = vpack.c.bf16 %v693_v58, %v692_v57 }
 0x4a6   :  { %1044 = vtanh.f32 %v312_v60 }
 0x4b0   :  { %v1045_v5 = vpop.eup %1044 }
 0x4b1   :  { %315 = vrot.lane.b32.xlu0 %v1045_v5, %s1078_s13 }
 0x4b5   :  { %334 = vrot.lane.b32.xlu0 %v333_v12, %s1078_s13 }
 0x523   :  { %v316_v13 = vpop.permute.xlu0 %315 }
 0x524   :  { %v1225_v14 = vmul.f32 %v1043_v54, %v316_v13 }
 0x526   :  { %324 = vrot.lane.b32.xlu1 %v1225_v14, %s1079_s16 }
 0x527   :  { %v335_v16 = vpop.permute.xlu0 %334 }
 0x598   :  { %v325_v15 = vpop.permute.xlu1 %324 }
 0x599   :  { %943 = vmatmul.mubr.msk.f32.vlgmr.msra.gmra.mrb[8].mxu1 %vm186_vm2, %v325_v15 }
 0x59a   :  { %949 = vmatprep.mubr.msk.f32.mxu1 %vm1077_vm0, %v1076_v1  ;;  %993 = vmatpush3.bf16.msra.mxu1 %v992_v31 }
 0x59b   :  { %1000 = vmatprep.subr.bf16.mxu1 %v1080_v0 }
 0x66c   :  { %v405_v17 = vpop.f32.mrb[8].mxu1 }
 0x66d   :  { %v406_v18 = vadd.f32 %v405_v17, %v335_v16  ;;  %v944_v19 = vpop.f32.mrb[9].mxu1 }
 0x66f   :  { %v410_v20 = vsel %vm409_vm3, %v406_v18, -inf }
 0x670   :  { %411 = vmax.xlane.f32.xlu1 %v410_v20 }
 0x681   :  { %808 = vrot.lane.b32.xlu1 %v807_v21, %s1082_s4 }
 0x685   :  { %793 = vrot.lane.b32.xlu1 %v792_v22, %s1082_s4 }
 0x6fd   :  { %v412_v23 = vpop.xlane.xlu1 %411 }
 0x6fe   :  { %v413_v24 = vsub.f32 %v406_v18, %v412_v23  ;;  %v862_v23 = vld [vmem:[%s1330_s3 + $0x61] ss:$0 sm:$0xff] }
 0x700   :  { %v414_v25 = vmul.f32 1.442695, %v413_v24 }
 0x701   :  { %v809_v26 = vpop.permute.xlu1 %808 }
 0x702   :  { %1046 = vpow2.f32 %v414_v25  ;;  %811 = vst.msk [vmem:[#allocation2 + $0x2] sm:$0x3] %vm654_vm4, %v809_v26  ;;  %v863_v25 = vld [vmem:[%s1330_s3 + $0x62] ss:$0 sm:$0xff] }
 0x703   :  { %812 = vst.msk [vmem:[#allocation2 + $0x2] sm:$0x3] %vm783_vm5, %v312_v60 }
 0x705   :  { %v794_v33 = vpop.permute.xlu1 %793 }
 0x70c   :  { %v1047_v27 = vpop.eup %1046 }
 0x70d   :  { %v416_v28 = vsel %vm409_vm3, %v1047_v27, 0.0 }
 0x70e   :  { %417 = vadd.xlane.f32.xlu0 %v416_v28 }
 0x79b   :  { %v418_v38 = vpop.xlane.xlu0 %417 }
 0x79c   :  { %1048 = vrcp.f32 %v418_v38 }
 0x7a6   :  { %v1049_v41 = vpop.eup %1048 }
 0x7a7   :  { %v420_v43 = vmul.f32 %v1049_v41, %v1047_v27 }
 0x7a9   :  { %950 = vmatmul.mubr.msk.f32.vlgmr.msra.gmra.mrb[10].mxu1 %vm423_vm6, %v420_v43  ;;  %v819_v50 = vrot.slane %v420_v43, %v1221_v11 }
 0x7aa   :  { %1002 = vmatpush3.bf16.msra.mxu1 %v1001_v42  ;;  %971 = vmatprep.mubr.msk.f32.mxu1 %vm1077_vm0, %v1076_v1 }
 0x7ab   :  { %1003 = vmatprep.subr.bf16.mxu1 %v1080_v0 }
 0x7ae   :  { %1005 = vmatpush3.bf16.msra.mxu1 %v1004_v46 }
 0x7b1   :  { %972 = vmatmul.mubr.msk.f32.vlgmr.msra.gmra.mrb[12].mxu1 %vm186_vm2, %v325_v15 }
 0x87c   :  { %v493_v47 = vpop.f32.mrb[10].mxu1 }
 0x87d   :  { %v779_v48 = vrot.slane %v493_v47, %v1221_v11  ;;  %v951_v49 = vpop.f32.mrb[11].mxu1  ;;  %961 = vmatmul.mubr.msk.f32.vlgmr.msra.gmra.mrb[4].mxu0 %vm186_vm2, %v493_v47 }
 0x87e   :  { %982 = vmatprep.mubr.msk.f32.mxu0 %vm1077_vm0, %v1076_v1  ;;  %v691_v1 = vld [vmem:[%s1330_s3 + $0x48] sm:$0xff] }
 0x87f   :  { %780 = vrot.lane.b32.xlu0 %v779_v48, %s1079_s16  ;;  %v1007_v56 = vpack.c.bf16 %v691_v1, %v690_v55 }
 0x881   :  { %1008 = vmatpush3.bf16.msra.mxu0 %v1007_v56 }
 0x882   :  { %1009 = vmatprep.subr.bf16.mxu0 %v1080_v0 }
 0x883   :  { %820 = vrot.lane.b32.xlu0 %v819_v50, %s1078_s13 }
 0x884   :  { %v644_v51 = vpop.f32.mrb[12].mxu1 }
 0x885   :  { %v973_v52 = vpop.f32.mrb[13].mxu1  ;;  %1011 = vmatpush3.bf16.msra.mxu0 %v1010_v59 }
 0x8f1   :  { %v781_v53 = vpop.permute.xlu0 %780 }
 0x8f5   :  { %v821_v54 = vpop.permute.xlu0 %820 }
 0x8f6   :  { %824 = vst.msk [vmem:[#allocation2 + $0x2] sm:$0x3] %vm823_vm7, %v821_v54 }
 0x950   :  { %v574_v60 = vpop.f32.mrb[4].mxu0 }
 0x951   :  { %v645_v62 = vadd.f32 %v644_v51, %v574_v60  ;;  %v962_v63 = vpop.f32.mrb[5].mxu0 }
 0x953   :  { %v653_v2 = vadd.f32 %v861_v61, %v645_v62 }
 0x955   :  { %v655_v0 = vsel %vm654_vm4, %v653_v2, 0.0 }
 0x956   :  { %v656_v3 = vrot.slane %v655_v0, 4 }
 0x958   :  { %v657_v4 = vadd.f32 %v656_v3, %v655_v0 }
 0x95a   :  { %v658_v5 = vrot.slane %v657_v4, 2 }
 0x95c   :  { %v659_v6 = vadd.f32 %v658_v5, %v657_v4 }
 0x95e   :  { %v660_v7 = vrot.slane %v659_v6, 1 }
 0x960   :  { %v661_v8 = vadd.f32 %v660_v7, %v659_v6 }
 0x962   :  { %v663_v9 = vmul.f32 0.5, %v661_v8 }
 0x964   :  { %v664_v10 = vsub.f32 %v653_v2, %v663_v9 }
 0x966   :  { %v665_v11 = vmul.f32 %v664_v10, %v664_v10 }
 0x968   :  { %v666_v12 = vsel %vm654_vm4, %v665_v11, 0.0 }
 0x969   :  { %v667_v13 = vrot.slane %v666_v12, 4 }
 0x96b   :  { %v668_v15 = vadd.f32 %v667_v13, %v666_v12 }
 0x96d   :  { %v669_v16 = vrot.slane %v668_v15, 2 }
 0x96f   :  { %v670_v17 = vadd.f32 %v669_v16, %v668_v15 }
 0x971   :  { %v671_v18 = vrot.slane %v670_v17, 1 }
 0x973   :  { %v672_v19 = vadd.f32 %v671_v18, %v670_v17 }
 0x975   :  { %v673_v20 = vmul.f32 0.5, %v672_v19 }
 0x977   :  { %v674_v21 = vadd.f32 1e-05, %v673_v20 }
 0x979   :  { %1050 = vrsqrt.f32 %v674_v21 }
 0x983   :  { %v1051_v22 = vpop.eup %1050 }
 0x984   :  { %v676_v24 = vmul.f32 %v1051_v22, %v664_v10 }
 0x986   :  { %v682_v26 = vmul.f32 %v862_v23, %v676_v24 }
 0x988   :  { %v688_v27 = vadd.f32 %v863_v25, %v682_v26 }
 0x98a   :  { %v689_v28 = vmax.f32 %v688_v27, 0.0 }
 0x98c   :  { %983 = vmatmul.mubr.msk.f32.vlgmr.msra.gmra.mrb[6].mxu0 %vm186_vm2, %v689_v28 }
 0xa5f   :  { %v768_v30 = vpop.f32.mrb[6].mxu0 }
 0xa60   :  { %v769_v31 = vadd.f32 %v864_v29, %v768_v30  ;;  %v984_v32 = vpop.f32.mrb[7].mxu0 }
 0xa62   :  { %772 = vst.msk [vmem:[#allocation2] sm:$0x3] %vm654_vm4, %v769_v31 }
 0xa63   :  { %784 = vst.msk [vmem:[#allocation2] sm:$0x3] %vm783_vm5, %v781_v53 }
 0xa64   :  { %797 = vst.msk [vmem:[#allocation2] sm:$0x3] %vm796_vm8, %v794_v33 }
 0xa65   :  { %799 = vst.msk [vmem:[#allocation2] sm:$0x3] %vm798_vm9, %v1225_v14 }
 0xa66   :  { %1063 = shalt.err (!%p1060_p4)
}
 0xa67   :  { %s1064_s25 = scalar_lea.hbm %s1333_s6, 64 }
 0xa68   :  { %p1065_p5 = scmp.ne.s32.totalorder %s1333_s6, %s1064_s25  ;;  %p1068_p6 = scmp.lt.u32.totalorder %s1064_s25, %s1333_s6 }
 0xa6a   :  { %p1070_p7 = pnand %p1068_p6, %p1065_p5 }
 0xa6c   :  { %1073 = shalt.err (!%p1070_p7)
}
 0xa6d   :  { %834 = dma.vmem_to_hbm [thread:$0]  %s832_s22, 64, %s1333_s6, [#allocation3]  }
 0xa6e   :  { %1074 = dma.done.wait [#allocation3], 64  }
 0xa6f   :  { %1075 = vsyncadd [#allocation3], 4294967232 }
 0xa70   :  { %838 = vsyncpa [#allocation3], 1 }

</bundles_post_ra>
